<compile_context>
chip_gen: v7x
topology: tpu7x:2x2x1
jax: 0.10.0
libtpu: 0.0.40
codegen_flags: <defaults>
</compile_context>

<pallas_src>
import functools
import math

import jax
import jax.numpy as jnp
from jax import lax
from jax.experimental import pallas as pl
from jax.experimental.pallas import tpu as pltpu


def _pick_heads_per_block(n_heads, head_size):
    """Choose how many heads one grid step processes (aim for 128 lanes)."""
    hpb = min(n_heads, max(1, 128 // max(1, head_size)))
    while n_heads % hpb:
        hpb -= 1
    # The output block's lane width must be the full hidden dim or a multiple
    # of 128; otherwise collapse to a single group (block == full H).
    if hpb < n_heads and (hpb * head_size) % 128 != 0:
        hpb = n_heads
    return hpb


def _attn_kernel(h_ref, w_ref, b_ref, mask_ref, o_ref, *,
                 head_size, heads_per_block):
    # h_ref:    (1, S, H)        f32 activations for one batch row
    # w_ref:    (1, H, 3G) bf16  head-group fused [Wq^T*scale | Wk^T | Wv^T]
    # b_ref:    (1, 1, 3G)  f32  matching fused bias
    # mask_ref: (1, 1, S)   f32  precomputed additive mask ((1-m)*-10000)
    # o_ref:    (1, S, G)        this group's columns of the output
    G = heads_per_block * head_size

    h = h_ref[0].astype(jnp.bfloat16)                       # (S, H) bf16

    # Fused, lane-dense QKV projection for this head group: bf16 MXU, f32 acc.
    qkv = jnp.dot(h, w_ref[0],
                  preferred_element_type=jnp.float32) + b_ref[0]   # (S, 3G) f32
    qkv = qkv.astype(jnp.bfloat16)                           # MXU operands

    add_mask = mask_ref[0]                                   # (1, S), broadcasts

    ctx_parts = []
    for j in range(heads_per_block):                         # small static unroll
        q = qkv[:, j * head_size:(j + 1) * head_size]        # (S, hs) bf16
        k = qkv[:, G + j * head_size:G + (j + 1) * head_size]
        v = qkv[:, 2 * G + j * head_size:2 * G + (j + 1) * head_size]

        # scores: (S, S) — contract last dims, no explicit k.T
        s = lax.dot_general(q, k, (((1,), (1,)), ((), ())),
                            preferred_element_type=jnp.float32)
        s = s + add_mask

        # numerically stable softmax along keys
        m = jnp.max(s, axis=-1, keepdims=True)
        e = jnp.exp(s - m)
        p = e * pl.reciprocal(jnp.sum(e, axis=-1, keepdims=True), approx=True)

        # TODO(synk): attention-prob dropout skipped (eval-mode semantics).

        ctx_parts.append(jnp.dot(p.astype(jnp.bfloat16), v,
                                 preferred_element_type=jnp.float32))  # (S, hs)

    # One lane-dense (S, G) store, already in the final (B, S, H) layout.
    o_ref[0] = jnp.concatenate(ctx_parts, axis=-1).astype(o_ref.dtype)


def prepare_params(params, *, n_heads):
    """One-time parameter prep (amortized at load time, not per forward).

    PyTorch Linear weight is (out=H, in=H); y = x @ W^T + b.  We build a
    head-group-major fused weight tensor of shape (n_groups, H, 3*G) in bf16,
    with the 1/sqrt(head_size) score scale folded into the Q slice, and the
    matching fused bias (kept f32: negligible size, better numerics).
    """
    H = params["wq"].shape[0]
    assert H % n_heads == 0
    hs = H // n_heads
    hpb = _pick_heads_per_block(n_heads, hs)
    n_groups = n_heads // hpb
    G = hpb * hs
    scale = 1.0 / math.sqrt(hs)

    wq = (params["wq"].T * scale).astype(jnp.bfloat16)       # (H, H)
    wk = params["wk"].T.astype(jnp.bfloat16)
    wv = params["wv"].T.astype(jnp.bfloat16)
    bq = (params["bq"] * scale).astype(jnp.float32)
    bk = params["bk"].astype(jnp.float32)
    bv = params["bv"].astype(jnp.float32)

    w_groups, b_groups = [], []
    for g in range(n_groups):
        cols = slice(g * G, (g + 1) * G)
        w_groups.append(jnp.concatenate(
            [wq[:, cols], wk[:, cols], wv[:, cols]], axis=1))   # (H, 3G)
        b_groups.append(jnp.concatenate([bq[cols], bk[cols], bv[cols]]))

    w_qkv = jnp.stack(w_groups, axis=0)                      # (n_groups, H, 3G) bf16
    b_qkv = jnp.stack(b_groups, axis=0)[:, None, :]          # (n_groups, 1, 3G) f32
    return {"w_qkv": w_qkv, "b_qkv": b_qkv, "heads_per_block": hpb}


def bert_self_attention(h_states, attention_mask, prepped, *, n_heads):
    """h_states: (B, S, H) f32; attention_mask: (B, S) of 0/1."""
    B, S, H = h_states.shape
    assert H % n_heads == 0
    hs = H // n_heads

    w_qkv = prepped["w_qkv"]
    b_qkv = prepped["b_qkv"]
    n_groups, _, three_g = w_qkv.shape
    G = three_g // 3
    hpb = G // hs
    assert hpb * n_groups == n_heads

    # Additive mask precomputed once per forward (matches the PyTorch
    # fp16-cast semantics exactly for 0/1 masks).
    add_mask = ((1.0 - attention_mask.astype(jnp.float32)) * -10000.0
                ).reshape(B, 1, S)

    h_spec = pl.BlockSpec((1, S, H), lambda b, g: (b, 0, 0))     # reused across g
    w_spec = pl.BlockSpec((1, H, 3 * G), lambda b, g: (g, 0, 0))
    b_spec = pl.BlockSpec((1, 1, 3 * G), lambda b, g: (g, 0, 0))
    m_spec = pl.BlockSpec((1, 1, S), lambda b, g: (b, 0, 0))
    o_spec = pl.BlockSpec((1, S, G), lambda b, g: (b, 0, g))

    kernel = functools.partial(_attn_kernel, head_size=hs,
                               heads_per_block=hpb)

    return pl.pallas_call(
        kernel,
        out_shape=jax.ShapeDtypeStruct((B, S, H), jnp.float32),
        grid_spec=pltpu.PrefetchScalarGridSpec(
            num_scalar_prefetch=0,
            grid=(B, n_groups),
            in_specs=[h_spec, w_spec, b_spec, m_spec],
            out_specs=o_spec,
        ),
        compiler_params=pltpu.CompilerParams(
            dimension_semantics=("parallel", "parallel"),
            vmem_limit_bytes=32 * 1024 * 1024),
    )(h_states, w_qkv, b_qkv, add_mask)


def _reference(h_states, attention_mask, params, *, n_heads):
    B, S, H = h_states.shape
    hs = H // n_heads

    def proj(w, b):
        y = h_states @ w.T + b                               # (B, S, H)
        return jnp.transpose(y.reshape(B, S, n_heads, hs), (0, 2, 1, 3))

    q = proj(params["wq"], params["bq"])
    k = proj(params["wk"], params["bk"])
    v = proj(params["wv"], params["bv"])
    scores = jnp.einsum("bhqd,bhkd->bhqk", q, k) / math.sqrt(hs)
    mask = attention_mask.astype(jnp.float32)[:, None, None, :]
    scores = scores + (1.0 - mask) * -10000.0
    p = jax.nn.softmax(scores, axis=-1)
    ctx = jnp.einsum("bhqk,bhkd->bhqd", p, v)
    return jnp.transpose(ctx, (0, 2, 1, 3)).reshape(B, S, H)


if __name__ == "__main__":
    B, S, H, n_heads = 2, 8, 32, 2

    key = jax.random.PRNGKey(0)
    k_h, k_q, k_k, k_v = jax.random.split(key, 4)

    h_states = jax.random.normal(k_h, (B, S, H), dtype=jnp.float32)
    # mask: first few positions kept, rest masked (1 = keep, 0 = mask)
    attention_mask = (jnp.arange(S)[None, :] < jnp.array([[6], [8]])).astype(
        jnp.float32)

    params = {
        "wq": 0.02 * jax.random.normal(k_q, (H, H), dtype=jnp.float32),
        "bq": jnp.zeros((H,), dtype=jnp.float32),
        "wk": 0.02 * jax.random.normal(k_k, (H, H), dtype=jnp.float32),
        "bk": jnp.zeros((H,), dtype=jnp.float32),
        "wv": 0.02 * jax.random.normal(k_v, (H, H), dtype=jnp.float32),
        "bv": jnp.zeros((H,), dtype=jnp.float32),
    }

    prepped = prepare_params(params, n_heads=n_heads)

    out = bert_self_attention(h_states, attention_mask, prepped,
                              n_heads=n_heads)
    out = jax.block_until_ready(out)

    ref = _reference(h_states, attention_mask, params, n_heads=n_heads)
    assert out.shape == (B, S, H)
    # bf16 weights + bf16 MXU operands + approx reciprocal -> slightly looser
    # tolerance vs the pure-f32 reference (expected BERT inference precision).
    assert jnp.allclose(out, ref, atol=1e-2, rtol=1e-2), (
        float(jnp.max(jnp.abs(out - ref))))

    print("KERNEL_OK")
</pallas_src>

<mosaic_0001>
module attributes {stable_mosaic.version = 11 : i64} {
  func.func @_attn_kernel(%arg0: i32, %arg1: i32, %arg2: memref<1x8x32xf32, #tpu.memory_space<vmem>>, %arg3: memref<1x32x96xbf16, #tpu.memory_space<vmem>>, %arg4: memref<1x1x96xf32, #tpu.memory_space<vmem>>, %arg5: memref<1x1x8xf32, #tpu.memory_space<vmem>>, %arg6: memref<1x8x32xf32, #tpu.memory_space<vmem>>) attributes {dimension_semantics = [#tpu.dimension_semantics<parallel>, #tpu.dimension_semantics<parallel>], iteration_bounds = array<i64: 2, 1>, scalar_prefetch = 0 : i64, scratch_operands = 0 : i64, tpu.core_type = #tpu.core_type<tc>, window_params = [{transform_indices = @transform_0, window_bounds = array<i64: 1, 8, 32>}, {transform_indices = @transform_1, window_bounds = array<i64: 1, 32, 96>}, {transform_indices = @transform_2, window_bounds = array<i64: 1, 1, 96>}, {transform_indices = @transform_3, window_bounds = array<i64: 1, 1, 8>}, {transform_indices = @transform_4, window_bounds = array<i64: 1, 8, 32>}]} {
    %c0 = arith.constant 0 : index
    %c0_0 = arith.constant 0 : index
    %c0_1 = arith.constant 0 : index
    %0 = vector.load %arg2[%c0, %c0_0, %c0_1] : memref<1x8x32xf32, #tpu.memory_space<vmem>>, vector<1x8x32xf32>
    %1 = vector.shape_cast %0 : vector<1x8x32xf32> to vector<8x32xf32>
    %2 = arith.truncf %1 : vector<8x32xf32> to vector<8x32xbf16>
    %c0_2 = arith.constant 0 : index
    %c0_3 = arith.constant 0 : index
    %c0_4 = arith.constant 0 : index
    %3 = vector.load %arg3[%c0_2, %c0_3, %c0_4] : memref<1x32x96xbf16, #tpu.memory_space<vmem>>, vector<1x32x96xbf16>
    %4 = vector.shape_cast %3 : vector<1x32x96xbf16> to vector<32x96xbf16>
    %cst = arith.constant dense<0.000000e+00> : vector<8x96xf32>
    %5 = tpu.matmul %2, %4, %cst {dimension_numbers = #tpu.dot_dimension_numbers<[1], [0], [0], [1], [0, 0, 1, 1], [], []>} : vector<8x32xbf16>, vector<32x96xbf16>, vector<8x96xf32> -> vector<8x96xf32>
    %c0_5 = arith.constant 0 : index
    %c0_6 = arith.constant 0 : index
    %c0_7 = arith.constant 0 : index
    %6 = vector.load %arg4[%c0_5, %c0_6, %c0_7] : memref<1x1x96xf32, #tpu.memory_space<vmem>>, vector<1x1x96xf32>
    %7 = vector.shape_cast %6 : vector<1x1x96xf32> to vector<1x96xf32>
    %8 = vector.broadcast %7 : vector<1x96xf32> to vector<8x96xf32>
    %9 = arith.addf %5, %8 : vector<8x96xf32>
    %10 = arith.truncf %9 : vector<8x96xf32> to vector<8x96xbf16>
    %c0_8 = arith.constant 0 : index
    %c0_9 = arith.constant 0 : index
    %c0_10 = arith.constant 0 : index
    %11 = vector.load %arg5[%c0_8, %c0_9, %c0_10] : memref<1x1x8xf32, #tpu.memory_space<vmem>>, vector<1x1x8xf32>
    %12 = vector.shape_cast %11 : vector<1x1x8xf32> to vector<1x8xf32>
    %13 = vector.extract_strided_slice %10 {offsets = [0, 0], sizes = [8, 16], strides = [1, 1]} : vector<8x96xbf16> to vector<8x16xbf16>
    %14 = vector.extract_strided_slice %10 {offsets = [0, 32], sizes = [8, 16], strides = [1, 1]} : vector<8x96xbf16> to vector<8x16xbf16>
    %15 = vector.extract_strided_slice %10 {offsets = [0, 64], sizes = [8, 16], strides = [1, 1]} : vector<8x96xbf16> to vector<8x16xbf16>
    %cst_11 = arith.constant dense<0.000000e+00> : vector<8x8xf32>
    %16 = tpu.matmul %13, %14, %cst_11 {dimension_numbers = #tpu.dot_dimension_numbers<[1], [1], [0], [0], [0, 0, 1, 0], [], []>} : vector<8x16xbf16>, vector<8x16xbf16>, vector<8x8xf32> -> vector<8x8xf32>
    %17 = vector.broadcast %12 : vector<1x8xf32> to vector<8x8xf32>
    %18 = arith.addf %16, %17 : vector<8x8xf32>
    %cst_12 = arith.constant dense<0xFF800000> : vector<8xf32>
    %19 = vector.multi_reduction <maximumf>, %18, %cst_12 [1] : vector<8x8xf32> to vector<8xf32>
    %20 = vector.shape_cast %19 : vector<8xf32> to vector<8x1xf32>
    %21 = vector.broadcast %20 : vector<8x1xf32> to vector<8x8xf32>
    %22 = arith.subf %18, %21 : vector<8x8xf32>
    %23 = math.exp %22 : vector<8x8xf32>
    %cst_13 = arith.constant dense<0.000000e+00> : vector<8xf32>
    %24 = vector.multi_reduction <add>, %23, %cst_13 [1] : vector<8x8xf32> to vector<8xf32>
    %25 = vector.shape_cast %24 : vector<8xf32> to vector<8x1xf32>
    %26 = tpu.reciprocal %25 {approx = true} : vector<8x1xf32> -> vector<8x1xf32>
    %27 = vector.broadcast %26 : vector<8x1xf32> to vector<8x8xf32>
    %28 = arith.mulf %23, %27 : vector<8x8xf32>
    %29 = arith.truncf %28 : vector<8x8xf32> to vector<8x8xbf16>
    %cst_14 = arith.constant dense<0.000000e+00> : vector<8x16xf32>
    %30 = tpu.matmul %29, %15, %cst_14 {dimension_numbers = #tpu.dot_dimension_numbers<[1], [0], [0], [1], [0, 0, 1, 1], [], []>} : vector<8x8xbf16>, vector<8x16xbf16>, vector<8x16xf32> -> vector<8x16xf32>
    %31 = vector.extract_strided_slice %10 {offsets = [0, 16], sizes = [8, 16], strides = [1, 1]} : vector<8x96xbf16> to vector<8x16xbf16>
    %32 = vector.extract_strided_slice %10 {offsets = [0, 48], sizes = [8, 16], strides = [1, 1]} : vector<8x96xbf16> to vector<8x16xbf16>
    %33 = vector.extract_strided_slice %10 {offsets = [0, 80], sizes = [8, 16], strides = [1, 1]} : vector<8x96xbf16> to vector<8x16xbf16>
    %cst_15 = arith.constant dense<0.000000e+00> : vector<8x8xf32>
    %34 = tpu.matmul %31, %32, %cst_15 {dimension_numbers = #tpu.dot_dimension_numbers<[1], [1], [0], [0], [0, 0, 1, 0], [], []>} : vector<8x16xbf16>, vector<8x16xbf16>, vector<8x8xf32> -> vector<8x8xf32>
    %35 = vector.broadcast %12 : vector<1x8xf32> to vector<8x8xf32>
    %36 = arith.addf %34, %35 : vector<8x8xf32>
    %cst_16 = arith.constant dense<0xFF800000> : vector<8xf32>
    %37 = vector.multi_reduction <maximumf>, %36, %cst_16 [1] : vector<8x8xf32> to vector<8xf32>
    %38 = vector.shape_cast %37 : vector<8xf32> to vector<8x1xf32>
    %39 = vector.broadcast %38 : vector<8x1xf32> to vector<8x8xf32>
    %40 = arith.subf %36, %39 : vector<8x8xf32>
    %41 = math.exp %40 : vector<8x8xf32>
    %cst_17 = arith.constant dense<0.000000e+00> : vector<8xf32>
    %42 = vector.multi_reduction <add>, %41, %cst_17 [1] : vector<8x8xf32> to vector<8xf32>
    %43 = vector.shape_cast %42 : vector<8xf32> to vector<8x1xf32>
    %44 = tpu.reciprocal %43 {approx = true} : vector<8x1xf32> -> vector<8x1xf32>
    %45 = vector.broadcast %44 : vector<8x1xf32> to vector<8x8xf32>
    %46 = arith.mulf %41, %45 : vector<8x8xf32>
    %47 = arith.truncf %46 : vector<8x8xf32> to vector<8x8xbf16>
    %cst_18 = arith.constant dense<0.000000e+00> : vector<8x16xf32>
    %48 = tpu.matmul %47, %33, %cst_18 {dimension_numbers = #tpu.dot_dimension_numbers<[1], [0], [0], [1], [0, 0, 1, 1], [], []>} : vector<8x8xbf16>, vector<8x16xbf16>, vector<8x16xf32> -> vector<8x16xf32>
    %49 = tpu.concatenate %30, %48 in 1 : vector<8x16xf32>, vector<8x16xf32> -> vector<8x32xf32>
    %c0_19 = arith.constant 0 : index
    %c0_20 = arith.constant 0 : index
    %c0_21 = arith.constant 0 : index
    %50 = vector.load %arg6[%c0_19, %c0_20, %c0_21] : memref<1x8x32xf32, #tpu.memory_space<vmem>>, vector<1x8x32xf32>
    %51 = vector.shape_cast %50 : vector<1x8x32xf32> to vector<8x32xf32>
    %52 = vector.shape_cast %49 : vector<8x32xf32> to vector<1x8x32xf32>
    tpu.vector_store %arg6[%c0_19, %c0_20, %c0_21], %52 {strides = array<i32>} : memref<1x8x32xf32, #tpu.memory_space<vmem>>, vector<1x8x32xf32>,
    return
  }
  func.func @transform_0(%arg0: i32, %arg1: i32) -> (i32, i32, i32) {
    %c0_i32 = arith.constant 0 : i32
    %c0_i32_0 = arith.constant 0 : i32
    %c0_i32_1 = arith.constant 0 : i32
    return %arg0, %c0_i32, %c0_i32_0 : i32, i32, i32
  }
  func.func @transform_1(%arg0: i32, %arg1: i32) -> (i32, i32, i32) {
    %c0_i32 = arith.constant 0 : i32
    %c0_i32_0 = arith.constant 0 : i32
    %c0_i32_1 = arith.constant 0 : i32
    return %arg1, %c0_i32, %c0_i32_0 : i32, i32, i32
  }
  func.func @transform_2(%arg0: i32, %arg1: i32) -> (i32, i32, i32) {
    %c0_i32 = arith.constant 0 : i32
    %c0_i32_0 = arith.constant 0 : i32
    %c0_i32_1 = arith.constant 0 : i32
    return %arg1, %c0_i32, %c0_i32_0 : i32, i32, i32
  }
  func.func @transform_3(%arg0: i32, %arg1: i32) -> (i32, i32, i32) {
    %c0_i32 = arith.constant 0 : i32
    %c0_i32_0 = arith.constant 0 : i32
    %c0_i32_1 = arith.constant 0 : i32
    return %arg0, %c0_i32, %c0_i32_0 : i32, i32, i32
  }
  func.func @transform_4(%arg0: i32, %arg1: i32) -> (i32, i32, i32) {
    %c0_i32 = arith.constant 0 : i32
    %c0_i32_0 = arith.constant 0 : i32
    return %arg0, %c0_i32, %arg1 : i32, i32, i32
  }
}

</mosaic_0001>

<bundles_post_ra>
// kernel: tpu_custom_call.1
= control target key start
LH: loop header
LB: loop body
LE: loop exit
PB: predicated region body
PF: predicated region fallthrough
CT: control target
= control target key end

     0   :  { %9 = vsyncpa [#allocation3], 0  ;;  %s1311_s0 = inlined_call_operand.hbm [shape: f32[2,8,32], index: 0, kind: input, shape index: {}]   ;;  %s1312_s1 = inlined_call_operand.hbm [shape: bf16[1,32,96], index: 1, kind: input, shape index: {}]   ;;  %s1313_s2 = inlined_call_operand.vmem [shape: f32[1,1,96], index: 2, kind: input, shape index: {}]   ;;  %s1314_s3 = inlined_call_operand.vmem [shape: f32[2,1,8], index: 3, kind: input, shape index: {}]   ;;  %s1315_s4 = inlined_call_operand.hbm [shape: f32[2,8,32], index: 4, kind: output, shape index: {}]  }
   0x1   :  { %11 = vsyncpa [#allocation3 + $0x1], 0 }
   0x2   :  { %12 = vsyncpa [#allocation6], 0 }
   0x3   :  { %13 = vsyncpa [#allocation4], 0 }
   0x4   :  { %15 = vsyncpa [#allocation4 + $0x1], 0  ;;  %s1056_s15 = smov 0   ;;  %s1058_s16 = smov 0  }
   0x5   :  { %s1060_s17 = smov 0   ;;  %s1062_s18 = smov 0  }
   0x6   :  { %s1064_s19 = smov 0   ;;  %s1066_s20 = smov 0  }
   0x7 LB: > { %s711_s21 = sadd.s32 4294967295, %s1016_s20   ;;  %s712_s22 = sadd.s32 4294967294, %s1016_s20   ;;  %s1016_s20 = sphi %s1066_s20, %s21_s20   ;;  %s1012_s19 = sphi %s1064_s19, %s1339_s19   ;;  %s1008_s18 = sphi %s1062_s18, %s1338_s18   ;;  %s1004_s17 = sphi %s1060_s17, %s1337_s17   ;;  %s1000_s16 = sphi %s1058_s16, %s1336_s16   ;;  %s996_s15 = sphi %s1056_s15, %s1335_s15  }
   0x8   : > { %p53_p0 = scmp.ne.s32.totalorder %s1000_s16, %s996_s15  ;;  %p1090_p1 = scmp.eq.s32.totalorder %s711_s21, 0 }
   0x9   : > { %p1094_p2 = scmp.eq.s32.totalorder %s711_s21, 1  ;;  %p163_p3 = scmp.eq.s32.totalorder %s712_s22, 1 }
   0xa   : > { %s1320_s23 = scalar_select %p1090_p1, 1, 0 }
   0xb   : > { %s1321_s24 = scalar_select %p1094_p2, 1, 0 }
   0xc   : > { %p1100_p4 = por %p1090_p1, %p53_p0  ;;  %p713_p5 = scmp.ge.s32.totalorder %s1016_s20, 1 }
   0xd   : > { %p1105_p6 = por %p163_p3, %p53_p0  ;;  %p170_p7 = scmp.lt.s32.totalorder %s1016_s20, 3 }
   0xe   : > { %s1322_s25 = scalar_select %p1100_p4, 1, 0 }
   0xf   : > { %s1323_s26 = scalar_select %p1105_p6, 1, 0 }
  0x10   : > { %p1110_p8 = pnand %p713_p5, %p170_p7  ;;  %s1018_s28 = smov [#allocation5]  }
  0x11   : > { %s185_s29 = sshll.u32 %s1018_s28, 4  ;;  %s33_s5 = sadd.s32 1, %s1012_s19  ;;  %s186_s29 = int_to_ptr.vmem [resolvable:$true] %s185_s29 }
  0x12   : > { %s1324_s27 = scalar_select %p1110_p8, 1, 0 }
  0x13   : > { %p787_p9 = pneg %p1110_p8  ;;  %s872_s8 = scalar_lea.hbm %s1312_s1, 256 }
  0x14   : > { %p873_p12 = scmp.ne.s32.totalorder %s1312_s1, %s872_s8  ;;  %p879_p5 = scmp.lt.u32.totalorder %s872_s8, %s1312_s1 }
  0x15   : > { %p1119_p11 = pnand %p787_p9, %p1090_p1 }
  0x17   : > { %p874_p13 = pneg %p1119_p11 }
  0x19   : > { %p875_p0 = pnand %p874_p13, %p873_p12 }
  0x1b   : > { %p876_p3 = pneg %p875_p0 }
  0x1d   : > { %p881_p7 = pnand %p879_p5, %p876_p3 }
  0x1f   : > { %884 = shalt.err (!%p881_p7)
}
  0x20   : > { %s885_s13 = scalar_lea.vmem %s186_s29, 256  ;;  %p893_p1 = scmp.lt.s32.totalorder %s186_s29, %s186_s29 }
  0x21   : > { %p886_p9 = scmp.ne.s32.totalorder %s186_s29, %s885_s13  ;;  %p894_p4 = scmp.lt.s32.totalorder %s885_s13, %s885_s13 }
  0x23   : > { %p888_p10 = pnand %p886_p9, %p874_p13  ;;  %p895_p8 = por %p894_p4, %p893_p1 }
  0x25   : > { %p889_p6 = pneg %p888_p10 }
  0x27   : > { %p896_p2 = pnand %p895_p8, %p889_p6 }
  0x29   : > { %899 = shalt.err (!%p896_p2)
}
  0x2a   : > { %s1019_s14 = smov 64   ;;  %s1020_s21 = smov 4  }
  0x2b   : > { %790 = dma.hbm_to_vmem [thread:$0]  (!%p1119_p11), %s1312_s1, 256, %s186_s29, [#allocation6], %s1019_s14, %s1019_s14, %s1020_s21  }
  0x2c   : > { %p35_p1 = scmp.ge.s32.totalorder %s33_s5, 2  ;;  %s40_s6 = sadd.s32 1, %s1004_s17 }
  0x2d   : > { %p47_p2 = scmp.ne.s32.totalorder %s1004_s17, %s1000_s16  ;;  %p48_p4 = scmp.eq.s32.totalorder %s1016_s20, 0 }
  0x2e   : > { %s1341_s5 = smov (%p35_p1, %s33_s5), 0  ;;  %p1327_p8 = scmp.ne.s32.totalorder %s1321_s24, 0 }
  0x2f   : > { %p1146_p6 = por %p48_p4, %p47_p2  ;;  %s37_s30 = ssub.s32 %s1012_s19, %s1341_s5 }
  0x30   : > { %p1152_p10 = por %p1327_p8, %p47_p2  ;;  %p800_p12 = scmp.lt.s32.totalorder %s1016_s20, 2 }
  0x31   : > { %p38_p11 = scmp.eq.s32.totalorder %s37_s30, 0  ;;  %s205_s29 = sand.u32 1, %s1004_s17  }
  0x32   : > { %s717_s9 = sshll.u32 %s205_s29, 3  ;;  %s718_s11 = sshll.u32 %s1012_s19, 7 }
  0x33   : > { %s1161_s10 = scalar_select %p38_p11, %s1004_s17, %s40_s6  }
  0x34   : > { %s1167_s14 = scalar_lea.hbm %s1311_s0, %s718_s11  ;;  %s209_s24 = scalar_lea.vmem [#allocation2], %s717_s9 }
  0x35   : > { %s216_s21 = sshll.u32 %s209_s24, 4  ;;  %p1173_p13 = pnand %p800_p12, %p1146_p6  ;;  %s1169_s21 = int_to_ptr.vmem [resolvable:$true] %s216_s21 }
  0x36   : > { %s206_s28 = scalar_lea.sflag [#allocation3], %s205_s29  ;;  %s900_s6 = scalar_lea.hbm %s1167_s14, 128 }
  0x37   : > { %p901_p0 = scmp.ne.s32.totalorder %s1167_s14, %s900_s6  ;;  %p902_p3 = pneg %p1173_p13 }
  0x38   : > { %s905_s11 = scalar_lea.hbm %s1311_s0, 256  ;;  %p906_p9 = scmp.lt.u32.totalorder %s1167_s14, %s1311_s0 }
  0x39   : > { %p903_p5 = pnand %p902_p3, %p901_p0  ;;  %p907_p1 = scmp.lt.u32.totalorder %s905_s11, %s900_s6 }
  0x3a   : > { %p909_p4 = scmp.lt.u32.totalorder %s900_s6, %s1167_s14 }
  0x3b   : > { %p904_p7 = pneg %p903_p5  ;;  %p908_p2 = por %p907_p1, %p906_p9 }
  0x3d   : > { %p910_p6 = por %p909_p4, %p908_p2 }
  0x3f   : > { %p911_p8 = pnand %p910_p6, %p904_p7 }
  0x41   : > { %914 = shalt.err (!%p911_p8)
}
  0x42   : > { %s915_s29 = scalar_lea.vmem %s1169_s21, 128  ;;  %s1021_s13 = smov [#allocation2]  }
  0x43   : > { %p916_p12 = scmp.ne.s32.totalorder %s1169_s21, %s915_s29  ;;  %s920_s24 = sshll.u32 %s1021_s13, 4  ;;  %s921_s24 = int_to_ptr.vmem [resolvable:$false] %s920_s24 }
  0x44   : > { %s922_s30 = scalar_lea.vmem %s921_s24, 256  ;;  %p923_p5 = scmp.lt.s32.totalorder %s1169_s21, %s921_s24 }
  0x45   : > { %p918_p11 = pnand %p916_p12, %p902_p3  ;;  %p924_p9 = scmp.lt.s32.totalorder %s922_s30, %s915_s29 }
  0x47   : > { %p919_p0 = pneg %p918_p11  ;;  %p925_p1 = por %p924_p9, %p923_p5 }
  0x49   : > { %p926_p2 = pnand %p925_p1, %p919_p0 }
  0x4b   : > { %929 = shalt.err (!%p926_p2)
}
  0x4c   : > { %794 = dma.hbm_to_vmem [thread:$0]  (!%p1173_p13), %s1167_s14, 128, %s1169_s21, %s206_s28  }
  0x4d   : > { %p1330_p7 = scmp.ne.s32.totalorder %s1324_s27, 0 }
  0x4e   : > { %s1205_s6 = sand.u32 (!%p1330_p7), 1, %s1000_s16   ;;  %p1331_p3 = scmp.ne.s32.totalorder (!%p1330_p7), %s1322_s25, 0 }
  0x4f   : > { %231 = sbr.rel (%p1330_p7) target bundleno = 1319 (0x527), region = 36  ;;  %s720_s9 = sshll.u32 (!%p1330_p7), %s1205_s6, 3 }
  0x50   : > { %s234_s11 = scalar_lea.sflag (!%p1330_p7), [#allocation3], %s1205_s6  ;;  %s237_s7 = scalar_lea.vmem (!%p1330_p7), [#allocation2], %s720_s9 }
  0x56   : > { %983 = dma.done.wait (%p1331_p3), %s234_s11, 128  }
  0x57   : > { %985 = vsyncadd (%p1331_p3), %s234_s11, 4294967168  ;;  %p1332_p13 = scmp.ne.s32.totalorder %s1320_s23, 0 }
  0x59   : > { %987 = dma.done.wait (%p1332_p13), [#allocation6], 256  }
  0x5a   : > { %989 = vsyncadd (%p1332_p13), [#allocation6], 4294967040  ;;  %v1022_v0 = vmov 0.0   ;;  %vm1023_vm0 = vmmov 0   ;;  %v862_v1 = vld [vmem:[#allocation5] sm:$0xff]   ;;  %v863_v2 = vld [vmem:[#allocation5 + $0x8] sm:$0xff]  }
  0x5b   : > { %747 = vmatprep.subr.bf16.mxu0 %v1022_v0  ;;  %751 = vmatprep.mubr.msk.bf16.mxu0 %vm1023_vm0, %v1022_v0  ;;  %v279_v3 = vld [vmem:[%s237_s7] sm:$0xff]  ;;  %vm304_vm1 = vcmask 261120   ;;  %s1024_s27 = smov 112   ;;  %s1025_s14 = smov 96   ;;  %vm359_vm2 = vcmask 130048   ;;  %vm406_vm3 = vcmask 64512  }
  0x5c   : > { %755 = vmatprep.subr.bf16.mxu1 %v1022_v0  ;;  %757 = vmatprep.mubr.msk.bf16.mxu1 %vm1023_vm0, %v1022_v0  ;;  %v280_v4 = vpack.c.bf16 %v279_v3, %v279_v3  ;;  %v723_v5 = vld [vmem:[%s1313_s2] ss:$0 sm:$0xff]  ;;  %s1026_s21 = smov 80   ;;  %p275_p4 = scmp.lt.s32.totalorder %s1008_s18, 1  ;;  %vm424_vm4 = vcmask 1043456  }
  0x5d   : > { %748 = vmatpush3.bf16.msra.mxu0 %v862_v1  ;;  %s1027_s13 = smov 64   ;;  %s1028_s24 = smov 48  }
  0x5e   : > { %749 = vmatprep.subr.bf16.mxu0 %v1022_v0  ;;  %s276_s22 = scalar_select %p275_p4, %s1008_s18, 1 }
  0x5f   : > { %s1029_s30 = smov 16   ;;  %s733_s11 = sshll.u32 %s1008_s18, 7 }
  0x60   : > { %s277_s29 = scalar_lea.vmem %s1314_s3, %s276_s22  ;;  %s271_s7 = scalar_lea.vmem [#allocation7], %s720_s9 }
  0x61   : > { %750 = vmatpush3.bf16.msra.mxu0 %v863_v2  ;;  %v727_v17 = vld [vmem:[%s277_s29] ss:$0 sm:$0xff]  ;;  %s599_s23 = sshll.u32 %s271_s7, 4  ;;  %s1030_s9 = smov [#allocation7]   ;;  %s1262_s23 = int_to_ptr.vmem [resolvable:$true] %s599_s23 }
  0x62   : > { %761 = vmatprep.subr.bf16.mxu0 %v1022_v0  ;;  %s930_s18 = scalar_lea.vmem %s1262_s23, 128  ;;  %s934_s22 = sshll.u32 %s1030_s9, 4  ;;  %s935_s22 = int_to_ptr.vmem [resolvable:$false] %s934_s22 }
  0x63   : > { %p931_p6 = scmp.ne.s32.totalorder %s1262_s23, %s930_s18  ;;  %s936_s28 = scalar_lea.vmem %s935_s22, 256 }
  0x64   : > { %752 = vmatmul.mubr.msk.bf16.vlgmr.msra.gmra.mrb[0].mxu0 %vm304_vm1, %v280_v4  ;;  %p937_p11 = scmp.lt.s32.totalorder %s1262_s23, %s935_s22  ;;  %p938_p0 = scmp.lt.s32.totalorder %s936_s28, %s930_s18 }
  0x65   : > { %763 = vmatprep.mubr.msk.bf16.mxu0 %vm1023_vm0, %v1022_v0  ;;  %p932_p8 = pnand %p931_p6, %p1152_p10 }
  0x66   : > { %p939_p5 = por %p938_p0, %p937_p11 }
  0x67   : > { %p933_p12 = pneg %p932_p8 }
  0x69   : > { %p940_p9 = pnand %p939_p5, %p933_p12 }
 0x137   : > { %v342_v6 = vpop.f32.mrb[0].mxu0 }
 0x138   : > { %v343_v7 = vadd.f32 %v723_v5, %v342_v6  ;;  %v753_v8 = vpop.f32.mrb[1].mxu0 }
 0x139   : > { %v345_v9 = vpop.f32.mrb[2].mxu0 }
 0x13a   : > { %v348_v10 = vpack.c.bf16 %v343_v7, %v343_v7  ;;  %v754_v11 = vpop.f32.mrb[3].mxu0 }
 0x13c   : > { %468 = vrot.lane.b32.xlu1 %v348_v10, %s1024_s27  ;;  %357 = vrot.lane.b32.xlu0 %v348_v10, %s1025_s14  ;;  %s1260_s14 = scalar_lea.hbm %s1315_s4, %s733_s11 }
 0x140   : > { %470 = vrot.lane.b32.xlu0 %v348_v10, %s1026_s21  ;;  %s585_s21 = scalar_lea.sflag [#allocation4], %s1205_s6 }
 0x1ae   : > { %v358_v12 = vpop.permute.xlu0 %357  ;;  %v469_v16 = vpop.permute.xlu1 %468 }
 0x1af   : > { %v364_v13 = vsel %vm359_vm2, %v358_v12, 0 }
 0x1b0   : > { %756 = vmatpush3.bf16.xpose.msra.mxu1 %v364_v13 }
 0x1b1   : > { %767 = vmatprep.subr.bf16.mxu1 %v1022_v0 }
 0x1b2   : > { %v471_v14 = vpop.permute.xlu0 %470 }
 0x1b3   : > { %v476_v15 = vsel %vm359_vm2, %v471_v14, 0 }
 0x1b7   : > { %758 = vmatmul.mubr.msk.bf16.vlgmr.msra.gmra.mrb[0].mxu1 %vm359_vm2, %v348_v10 }
 0x1b8   : > { %768 = vmatpush3.bf16.xpose.msra.mxu1 %v476_v15  ;;  %769 = vmatprep.mubr.msk.bf16.mxu1 %vm1023_vm0, %v1022_v0 }
 0x1bf   : > { %770 = vmatmul.mubr.msk.bf16.vlgmr.msra.gmra.mrb[4].mxu1 %vm359_vm2, %v469_v16 }
 0x28a   : > { %v400_v18 = vpop.f32.mrb[0].mxu1 }
 0x28b   : > { %v401_v19 = vadd.f32 %v727_v17, %v400_v18  ;;  %v759_v20 = vpop.f32.mrb[1].mxu1 }
 0x28c   : > { %v403_v21 = vpop.f32.mrb[2].mxu1 }
 0x28d   : > { %v760_v22 = vpop.f32.mrb[3].mxu1  ;;  %v407_v23 = vsel %vm406_vm3, %v401_v19, -inf }
 0x28e   : > { %408 = vmax.xlane.f32.xlu1 %v407_v23 }
 0x292   : > { %v512_v24 = vpop.f32.mrb[4].mxu1 }
 0x293   : > { %v513_v25 = vadd.f32 %v727_v17, %v512_v24  ;;  %v771_v26 = vpop.f32.mrb[5].mxu1 }
 0x294   : > { %v515_v27 = vpop.f32.mrb[6].mxu1 }
 0x295   : > { %v772_v28 = vpop.f32.mrb[7].mxu1  ;;  %v518_v29 = vsel %vm406_vm3, %v513_v25, -inf }
 0x296   : > { %519 = vmax.xlane.f32.xlu0 %v518_v29 }
 0x31b   : > { %v409_v30 = vpop.xlane.xlu1 %408 }
 0x31c   : > { %v410_v31 = vsub.f32 %v401_v19, %v409_v30 }
 0x31e   : > { %v411_v32 = vmul.f32 1.442695, %v410_v31 }
 0x320   : > { %864 = vpow2.f32 %v411_v32 }
 0x323   : > { %v520_v33 = vpop.xlane.xlu0 %519 }
 0x324   : > { %v521_v34 = vsub.f32 %v513_v25, %v520_v33 }
 0x326   : > { %v522_v35 = vmul.f32 1.442695, %v521_v34 }
 0x328   : > { %866 = vpow2.f32 %v522_v35 }
 0x32a   : > { %v865_v36 = vpop.eup %864 }
 0x32b   : > { %v413_v37 = vsel %vm406_vm3, %v865_v36, 0.0 }
 0x32c   : > { %414 = vadd.xlane.f32.xlu0 %v413_v37 }
 0x332   : > { %v867_v38 = vpop.eup %866 }
 0x333   : > { %v524_v39 = vsel %vm406_vm3, %v867_v38, 0.0 }
 0x334   : > { %525 = vadd.xlane.f32.xlu1 %v524_v39 }
 0x342   : > { %419 = vrot.lane.b32.xlu0 %v348_v10, %s1027_s13 }
 0x345   : > { %530 = vrot.lane.b32.xlu1 %v348_v10, %s1028_s24 }
 0x3b9   : > { %v415_v40 = vpop.xlane.xlu0 %414 }
 0x3ba   : > { %868 = vrcp.f32 %v415_v40 }
 0x3bd   : > { %v420_v41 = vpop.permute.xlu0 %419 }
 0x3be   : > { %v426_v42 = vsel %vm424_vm4, %v420_v41, 0 }
 0x3bf   : > { %762 = vmatpush3.bf16.msra.mxu0 %v426_v42 }
 0x3c0   : > { %773 = vmatprep.subr.bf16.mxu0 %v1022_v0 }
 0x3c1   : > { %v526_v43 = vpop.xlane.xlu1 %525 }
 0x3c2   : > { %870 = vrcp.f32 %v526_v43 }
 0x3c4   : > { %v869_v44 = vpop.eup %868 }
 0x3c5   : > { %v417_v45 = vmul.f32 %v869_v44, %v865_v36  ;;  %v531_v46 = vpop.permute.xlu1 %530 }
 0x3c6   : > { %v536_v48 = vsel %vm424_vm4, %v531_v46, 0 }
 0x3c7   : > { %v418_v47 = vpack.c.bf16 %v417_v45, %v417_v45 }
 0x3c9   : > { %764 = vmatmul.mubr.msk.bf16.vlgmr.msra.gmra.mrb[4].mxu0 %vm406_vm3, %v418_v47 }
 0x3ca   : > { %774 = vmatpush3.bf16.msra.mxu0 %v536_v48  ;;  %775 = vmatprep.mubr.msk.bf16.mxu0 %vm1023_vm0, %v1022_v0 }
 0x3cc   : > { %v871_v49 = vpop.eup %870 }
 0x3cd   : > { %v528_v50 = vmul.f32 %v871_v49, %v867_v38 }
 0x3cf   : > { %v529_v51 = vpack.c.bf16 %v528_v50, %v528_v50 }
 0x3d1   : > { %776 = vmatmul.mubr.msk.bf16.vlgmr.msra.gmra.mrb[8].mxu0 %vm406_vm3, %v529_v51 }
 0x49c   : > { %v462_v52 = vpop.f32.mrb[4].mxu0 }
 0x49d   : > { %v765_v53 = vpop.f32.mrb[5].mxu0 }
 0x49e   : > { %v465_v54 = vpop.f32.mrb[6].mxu0 }
 0x49f   : > { %v766_v55 = vpop.f32.mrb[7].mxu0 }
 0x4a4   : > { %v572_v56 = vpop.f32.mrb[8].mxu0 }
 0x4a5   : > { %579 = vrot.lane.b32.xlu1 %v572_v56, %s1029_s30  ;;  %v777_v57 = vpop.f32.mrb[9].mxu0 }
 0x4a6   : > { %v575_v58 = vpop.f32.mrb[10].mxu0 }
 0x4a7   : > { %v778_v59 = vpop.f32.mrb[11].mxu0 }
 0x517   : > { %v580_v60 = vpop.permute.xlu1 %579 }
 0x518   : > { %v582_v61 = vsel %vm359_vm2, %v462_v52, %v580_v60 }
 0x519   : > { %583 = vst.msk [vmem:[%s271_s7] sm:$0xff] %vm304_vm1, %v582_v61 }
 0x51a   : > { %943 = shalt.err (!%p940_p9)
}
 0x51b   : > { %s944_s6 = scalar_lea.hbm %s1260_s14, 128  ;;  %s948_s13 = scalar_lea.hbm %s1315_s4, 256 }
 0x51c   : > { %p945_p1 = scmp.ne.s32.totalorder %s1260_s14, %s944_s6  ;;  %p949_p3 = scmp.lt.u32.totalorder %s1260_s14, %s1315_s4 }
 0x51d   : > { %p950_p13 = scmp.lt.u32.totalorder %s948_s13, %s944_s6  ;;  %p952_p6 = scmp.lt.u32.totalorder %s944_s6, %s1260_s14 }
 0x51e   : > { %p946_p2 = pnand %p945_p1, %p1152_p10 }
 0x51f   : > { %p951_p4 = por %p950_p13, %p949_p3 }
 0x520   : > { %p947_p7 = pneg %p946_p2 }
 0x521   : > { %p953_p8 = por %p952_p6, %p951_p4 }
 0x523   : > { %p954_p12 = pnand %p953_p8, %p947_p7 }
 0x525   : > { %957 = shalt.err (!%p954_p12)
}
 0x526   : > { %785 = dma.vmem_to_hbm [thread:$0]  (%p1152_p10), %s1262_s23, 128, %s1260_s14, %s585_s21  }
 0x527 PF: > { %s611_s11 = sand.u32 1, %s996_s15   ;;  %p1333_p11 = scmp.ne.s32.totalorder %s1323_s26, 0 }
 0x528   : > { %p1334_p0 = scmp.ge.s32.totalorder %s1016_s20, 2  ;;  %s612_s7 = scalar_lea.sflag [#allocation4], %s611_s11 }
 0x52a   : > { %p796_p5 = pnand %p1334_p0, %p1333_p11 }
 0x52c   : > { %991 = dma.done.wait (!%p796_p5), %s612_s7, 128  }
 0x52d   : > { %993 = vsyncadd (!%p796_p5), %s612_s7, 4294967168  ;;  %s21_s20 = sadd.s32 1, %s1016_s20   ;;  %s1335_s15 = smov %s1000_s16 }
 0x52e   : > { %p18_p9 = scmp.ge.s32.totalorder %s21_s20, 4   ;;  %s1336_s16 = smov %s1004_s17 }
 0x52f   : > { %s1337_s17 = smov %s1161_s10  ;;  %s1338_s18 = smov %s1012_s19 }
 0x530   : > { %s1339_s19 = smov %s1341_s5  ;;  %20 = sbr.rel (!%p18_p9) target bundleno = 7 (0x7), region = 92 }
 0x537   :  { %617 = vsyncpa [#allocation3], 1 }
 0x538   :  { %619 = vsyncpa [#allocation3 + $0x1], 1 }
 0x539   :  { %620 = vsyncpa [#allocation6], 1 }
 0x53a   :  { %621 = vsyncpa [#allocation4], 1 }
 0x53b   :  { %623 = vsyncpa [#allocation4 + $0x1], 1 }

</bundles_post_ra>
